<compile_context>
chip_gen: v5e
topology: v5e:2x2
jax: 0.10.0
libtpu: 0.0.40
codegen_flags: <defaults>
</compile_context>

<pallas_src>
import jax
import jax.numpy as jnp
from jax.experimental import pallas as pl
from jax.experimental.pallas import tpu as pltpu

HIDDEN_DIM = 128
NUM_CHANNELS = 4
SEQ_LEN = 200
Z_DIM = 100
OUT_DIM = SEQ_LEN * NUM_CHANNELS  # 800
Z_PAD = 128                       # z / w1-rows padded 100 -> 128 (aligned K)
TB_MAX = 512                      # max batch tile (multiple of 8); ~6 MiB VMEM
                                  # with intermediates, fits v5e's 16 MiB scope


def _round_up(x, m):
    return (x + m - 1) // m * m


def generator_kernel(z_ref, w1_ref, b1_ref, w2_ref, b2_ref, w3_ref, b3_ref, o_ref):
    # Fused 3-layer MLP on one batch tile. Weights + z are bf16 (MXU-native);
    # dots accumulate in f32; elementwise epilogue stays f32 (v5e-safe);
    # final store is bf16 (halves the dominant HBM write).
    z = z_ref[...]                                                       # (TB, 128) bf16
    h1 = jnp.dot(z, w1_ref[...], preferred_element_type=jnp.float32) + b1_ref[...]
    h1 = jnp.maximum(h1, 0.0)                                            # ReLU
    h2 = jnp.dot(h1.astype(jnp.bfloat16), w2_ref[...],
                 preferred_element_type=jnp.float32) + b2_ref[...]
    h2 = jnp.maximum(h2, 0.0)                                            # ReLU
    h3 = jnp.dot(h2.astype(jnp.bfloat16), w3_ref[...],
                 preferred_element_type=jnp.float32) + b3_ref[...]
    o_ref[...] = jnp.tanh(h3).astype(o_ref.dtype)                        # Tanh, bf16 store


def generator_forward(z, params, tb_max=TB_MAX, out_dtype=jnp.bfloat16):
    """z: (B, Z_DIM) f32 -> (B, SEQ_LEN, NUM_CHANNELS) `out_dtype` (bf16 default)."""
    w1, b1, w2, b2, w3, b3 = params
    B = z.shape[0]

    # --- batch-tile selection: minimize padding, >=2 tiles when B >= 16 so
    # the "parallel" axis can shard across both TCs on v7x.
    n_tiles = pl.cdiv(B, tb_max)
    if B >= 16:
        n_tiles = max(n_tiles, 2)
    TB = _round_up(pl.cdiv(B, n_tiles), 8)       # sublane rule: multiple of 8
    B_pad = _round_up(B, TB)
    grid = (B_pad // TB,)

    # Zero-pad batch to a tile multiple and K 100 -> 128; cast to bf16 in the
    # wrapper (halves the z DMA; w1's pad rows are zero so padding is exact).
    zp = jnp.zeros((B_pad, Z_PAD), jnp.bfloat16).at[:B, :Z_DIM].set(
        z.astype(jnp.bfloat16))

    # Weights/biases: constant block index -> stay resident in VMEM across
    # all batch-tile grid steps (DMA'd once).
    resident = lambda arr: pl.BlockSpec(arr.shape, lambda i: (0, 0))

    bytes_accessed = (
        zp.size * 2                                             # bf16 z
        + (w1.size + w2.size + w3.size) * 2                     # bf16 weights
        + (b1.size + b2.size + b3.size) * 4                     # f32 biases
        + B_pad * OUT_DIM * 2                                   # bf16 output
    )
    cost = pl.CostEstimate(
        flops=2 * B_pad * (Z_PAD * HIDDEN_DIM
                           + HIDDEN_DIM * HIDDEN_DIM * 2
                           + HIDDEN_DIM * 2 * OUT_DIM),
        transcendentals=B_pad * OUT_DIM,
        bytes_accessed=bytes_accessed,
    )

    out_flat = pl.pallas_call(
        generator_kernel,
        out_shape=jax.ShapeDtypeStruct((B_pad, OUT_DIM), jnp.bfloat16),
        grid=grid,
        in_specs=[
            pl.BlockSpec((TB, Z_PAD), lambda i: (i, 0)),   # z tile (pipelined)
            resident(w1), resident(b1),
            resident(w2), resident(b2),
            resident(w3), resident(b3),
        ],
        out_specs=pl.BlockSpec((TB, OUT_DIM), lambda i: (i, 0)),
        compiler_params=pltpu.CompilerParams(
            dimension_semantics=("parallel",),             # v7x: both TCs
            vmem_limit_bytes=32 * 1024 * 1024),            # safe on v5e's 16MiB default
        cost_estimate=cost,
    )(zp, w1, b1, w2, b2, w3, b3)

    # PyTorch: self.net(z).view(-1, SEQ_LEN, NUM_CHANNELS)
    out = out_flat[:B].reshape(-1, SEQ_LEN, NUM_CHANNELS)
    return out if out_dtype == jnp.bfloat16 else out.astype(out_dtype)


def init_params(key):
    """Mirror nn.Linear's U(-1/sqrt(fan_in), 1/sqrt(fan_in)) init.

    Weights stored (fan_in, fan_out) in bf16 (transposed vs. PyTorch's
    (out, in)); w1 rows zero-padded 100 -> 128. Biases kept f32, shape (1, N).
    """
    def linear(key, fan_in, fan_out, pad_in=0):
        kw, kb = jax.random.split(key)
        bound = 1.0 / (fan_in ** 0.5)
        w = jax.random.uniform(kw, (fan_in, fan_out), jnp.float32, -bound, bound)
        if pad_in:
            w = jnp.pad(w, ((0, pad_in), (0, 0)))
        b = jax.random.uniform(kb, (1, fan_out), jnp.float32, -bound, bound)
        return w.astype(jnp.bfloat16), b

    k1, k2, k3 = jax.random.split(key, 3)
    w1, b1 = linear(k1, Z_DIM, HIDDEN_DIM, pad_in=Z_PAD - Z_DIM)
    w2, b2 = linear(k2, HIDDEN_DIM, HIDDEN_DIM * 2)
    w3, b3 = linear(k3, HIDDEN_DIM * 2, OUT_DIM)
    return (w1, b1, w2, b2, w3, b3)


def reference_forward(z, params):
    """Pure-JAX reference (f32 math on the same bf16-stored weights)."""
    w1, b1, w2, b2, w3, b3 = params
    zp = jnp.pad(z, ((0, 0), (0, Z_PAD - Z_DIM)))
    h1 = jnp.maximum(zp @ w1.astype(jnp.float32) + b1, 0.0)
    h2 = jnp.maximum(h1 @ w2.astype(jnp.float32) + b2, 0.0)
    out = jnp.tanh(h2 @ w3.astype(jnp.float32) + b3)
    return out.reshape(-1, SEQ_LEN, NUM_CHANNELS)


if __name__ == "__main__":
    key = jax.random.PRNGKey(0)
    kz, kp = jax.random.split(key)

    B = 8  # small batch for the smoke test
    z = jax.random.normal(kz, (B, Z_DIM), jnp.float32)
    params = init_params(kp)

    out = jax.block_until_ready(generator_forward(z, params))
    assert out.shape == (B, SEQ_LEN, NUM_CHANNELS), out.shape
    assert out.dtype == jnp.bfloat16, out.dtype

    ref = reference_forward(z, params)
    # bf16 weights / bf16 MXU inputs / bf16 output (adds ~4e-3 abs error on a
    # tanh bounded in [-1, 1]) -> absolute tolerance vs the f32 reference.
    err = float(jnp.max(jnp.abs(out.astype(jnp.float32) - ref)))
    assert err < 5e-2, f"mismatch vs reference, max abs err = {err}"

    print("KERNEL_OK")
</pallas_src>

<mosaic_0001>
module attributes {stable_mosaic.version = 11 : i64} {
  func.func @generator_kernel(%arg0: i32, %arg1: memref<8x128xbf16, #tpu.memory_space<vmem>>, %arg2: memref<128x128xbf16, #tpu.memory_space<vmem>>, %arg3: memref<1x128xf32, #tpu.memory_space<vmem>>, %arg4: memref<128x256xbf16, #tpu.memory_space<vmem>>, %arg5: memref<1x256xf32, #tpu.memory_space<vmem>>, %arg6: memref<256x800xbf16, #tpu.memory_space<vmem>>, %arg7: memref<1x800xf32, #tpu.memory_space<vmem>>, %arg8: memref<8x800xbf16, #tpu.memory_space<vmem>>) attributes {dimension_semantics = [#tpu.dimension_semantics<parallel>], iteration_bounds = array<i64: 1>, scalar_prefetch = 0 : i64, scratch_operands = 0 : i64, tpu.core_type = #tpu.core_type<tc>, window_params = [{transform_indices = @transform_0, window_bounds = array<i64: 8, 128>}, {pipeline_mode = #tpu.pipeline_mode<synchronous>, transform_indices = @transform_1, window_bounds = array<i64: 128, 128>}, {pipeline_mode = #tpu.pipeline_mode<synchronous>, transform_indices = @transform_2, window_bounds = array<i64: 1, 128>}, {pipeline_mode = #tpu.pipeline_mode<synchronous>, transform_indices = @transform_3, window_bounds = array<i64: 128, 256>}, {pipeline_mode = #tpu.pipeline_mode<synchronous>, transform_indices = @transform_4, window_bounds = array<i64: 1, 256>}, {pipeline_mode = #tpu.pipeline_mode<synchronous>, transform_indices = @transform_5, window_bounds = array<i64: 256, 800>}, {pipeline_mode = #tpu.pipeline_mode<synchronous>, transform_indices = @transform_6, window_bounds = array<i64: 1, 800>}, {transform_indices = @transform_7, window_bounds = array<i64: 8, 800>}]} {
    %c0 = arith.constant 0 : index
    %c0_0 = arith.constant 0 : index
    %0 = vector.load %arg1[%c0, %c0_0] : memref<8x128xbf16, #tpu.memory_space<vmem>>, vector<8x128xbf16>
    %c0_1 = arith.constant 0 : index
    %c0_2 = arith.constant 0 : index
    %1 = vector.load %arg2[%c0_1, %c0_2] : memref<128x128xbf16, #tpu.memory_space<vmem>>, vector<128x128xbf16>
    %cst = arith.constant dense<0.000000e+00> : vector<8x128xf32>
    %2 = tpu.matmul %0, %1, %cst {dimension_numbers = #tpu.dot_dimension_numbers<[1], [0], [0], [1], [0, 0, 1, 1], [], []>} : vector<8x128xbf16>, vector<128x128xbf16>, vector<8x128xf32> -> vector<8x128xf32>
    %c0_3 = arith.constant 0 : index
    %c0_4 = arith.constant 0 : index
    %3 = vector.load %arg3[%c0_3, %c0_4] : memref<1x128xf32, #tpu.memory_space<vmem>>, vector<1x128xf32>
    %4 = vector.broadcast %3 : vector<1x128xf32> to vector<8x128xf32>
    %5 = arith.addf %2, %4 : vector<8x128xf32>
    %cst_5 = arith.constant 0.000000e+00 : f32
    %6 = vector.broadcast %cst_5 : f32 to vector<8x128xf32>
    %7 = arith.maximumf %5, %6 : vector<8x128xf32>
    %8 = arith.truncf %7 : vector<8x128xf32> to vector<8x128xbf16>
    %c0_6 = arith.constant 0 : index
    %c0_7 = arith.constant 0 : index
    %9 = vector.load %arg4[%c0_6, %c0_7] : memref<128x256xbf16, #tpu.memory_space<vmem>>, vector<128x256xbf16>
    %cst_8 = arith.constant dense<0.000000e+00> : vector<8x256xf32>
    %10 = tpu.matmul %8, %9, %cst_8 {dimension_numbers = #tpu.dot_dimension_numbers<[1], [0], [0], [1], [0, 0, 1, 1], [], []>} : vector<8x128xbf16>, vector<128x256xbf16>, vector<8x256xf32> -> vector<8x256xf32>
    %c0_9 = arith.constant 0 : index
    %c0_10 = arith.constant 0 : index
    %11 = vector.load %arg5[%c0_9, %c0_10] : memref<1x256xf32, #tpu.memory_space<vmem>>, vector<1x256xf32>
    %12 = vector.broadcast %11 : vector<1x256xf32> to vector<8x256xf32>
    %13 = arith.addf %10, %12 : vector<8x256xf32>
    %cst_11 = arith.constant 0.000000e+00 : f32
    %14 = vector.broadcast %cst_11 : f32 to vector<8x256xf32>
    %15 = arith.maximumf %13, %14 : vector<8x256xf32>
    %16 = arith.truncf %15 : vector<8x256xf32> to vector<8x256xbf16>
    %c0_12 = arith.constant 0 : index
    %c0_13 = arith.constant 0 : index
    %17 = vector.load %arg6[%c0_12, %c0_13] : memref<256x800xbf16, #tpu.memory_space<vmem>>, vector<256x800xbf16>
    %cst_14 = arith.constant dense<0.000000e+00> : vector<8x800xf32>
    %18 = tpu.matmul %16, %17, %cst_14 {dimension_numbers = #tpu.dot_dimension_numbers<[1], [0], [0], [1], [0, 0, 1, 1], [], []>} : vector<8x256xbf16>, vector<256x800xbf16>, vector<8x800xf32> -> vector<8x800xf32>
    %c0_15 = arith.constant 0 : index
    %c0_16 = arith.constant 0 : index
    %19 = vector.load %arg7[%c0_15, %c0_16] : memref<1x800xf32, #tpu.memory_space<vmem>>, vector<1x800xf32>
    %20 = vector.broadcast %19 : vector<1x800xf32> to vector<8x800xf32>
    %21 = arith.addf %18, %20 : vector<8x800xf32>
    %22 = math.tanh %21 : vector<8x800xf32>
    %23 = arith.truncf %22 : vector<8x800xf32> to vector<8x800xbf16>
    %c0_17 = arith.constant 0 : index
    %c0_18 = arith.constant 0 : index
    %24 = vector.load %arg8[%c0_17, %c0_18] : memref<8x800xbf16, #tpu.memory_space<vmem>>, vector<8x800xbf16>
    tpu.vector_store %arg8[%c0_17, %c0_18], %23 {strides = array<i32>} : memref<8x800xbf16, #tpu.memory_space<vmem>>, vector<8x800xbf16>,
    return
  }
  func.func @transform_0(%arg0: i32) -> (i32, i32) {
    %c0_i32 = arith.constant 0 : i32
    %c0_i32_0 = arith.constant 0 : i32
    return %arg0, %c0_i32 : i32, i32
  }
  func.func @transform_1(%arg0: i32) -> (i32, i32) {
    %c0_i32 = arith.constant 0 : i32
    %c0_i32_0 = arith.constant 0 : i32
    %c0_i32_1 = arith.constant 0 : i32
    return %c0_i32, %c0_i32_0 : i32, i32
  }
  func.func @transform_2(%arg0: i32) -> (i32, i32) {
    %c0_i32 = arith.constant 0 : i32
    %c0_i32_0 = arith.constant 0 : i32
    %c0_i32_1 = arith.constant 0 : i32
    return %c0_i32, %c0_i32_0 : i32, i32
  }
  func.func @transform_3(%arg0: i32) -> (i32, i32) {
    %c0_i32 = arith.constant 0 : i32
    %c0_i32_0 = arith.constant 0 : i32
    %c0_i32_1 = arith.constant 0 : i32
    return %c0_i32, %c0_i32_0 : i32, i32
  }
  func.func @transform_4(%arg0: i32) -> (i32, i32) {
    %c0_i32 = arith.constant 0 : i32
    %c0_i32_0 = arith.constant 0 : i32
    %c0_i32_1 = arith.constant 0 : i32
    return %c0_i32, %c0_i32_0 : i32, i32
  }
  func.func @transform_5(%arg0: i32) -> (i32, i32) {
    %c0_i32 = arith.constant 0 : i32
    %c0_i32_0 = arith.constant 0 : i32
    %c0_i32_1 = arith.constant 0 : i32
    return %c0_i32, %c0_i32_0 : i32, i32
  }
  func.func @transform_6(%arg0: i32) -> (i32, i32) {
    %c0_i32 = arith.constant 0 : i32
    %c0_i32_0 = arith.constant 0 : i32
    %c0_i32_1 = arith.constant 0 : i32
    return %c0_i32, %c0_i32_0 : i32, i32
  }
  func.func @transform_7(%arg0: i32) -> (i32, i32) {
    %c0_i32 = arith.constant 0 : i32
    %c0_i32_0 = arith.constant 0 : i32
    return %arg0, %c0_i32 : i32, i32
  }
}

</mosaic_0001>

<bundles_post_ra>
// kernel: tpu_custom_call.1
= control target key start
LH: loop header
LB: loop body
LE: loop exit
PB: predicated region body
PF: predicated region fallthrough
CT: control target
= control target key end

     0   :  { %s2774_s0 = inlined_call_operand.vmem [shape: bf16[8,128], index: 0, kind: input, shape index: {}]   ;;  %s2775_s1 = inlined_call_operand.vmem [shape: bf16[128,128], index: 1, kind: input, shape index: {}]   ;;  %s2776_s2 = inlined_call_operand.vmem [shape: f32[1,128], index: 2, kind: input, shape index: {}]   ;;  %s2777_s3 = inlined_call_operand.vmem [shape: bf16[128,256], index: 3, kind: input, shape index: {}]   ;;  %s2778_s4 = inlined_call_operand.vmem [shape: f32[1,256], index: 4, kind: input, shape index: {}]   ;;  %s2779_s5 = inlined_call_operand.vmem [shape: bf16[256,800], index: 5, kind: input, shape index: {}]   ;;  %s2780_s6 = inlined_call_operand.vmem [shape: f32[1,800], index: 6, kind: input, shape index: {}]   ;;  %s2781_s7 = inlined_call_operand.hbm [shape: bf16[8,800], index: 7, kind: output, shape index: {}]  }
   0x1   :  { %v1728_v0 = vld [vmem:[%s2775_s1 + $0x38] sm:$0xff]  ;;  %v1727_v1 = vld [vmem:[%s2775_s1 + $0x30] sm:$0xff]  ;;  %v1259_v7 = vld [vmem:[%s2777_s3 + $0x60] sm:$0xf] }
   0x2   :  { %96 = vmatpush.bf16.msra.mxu0 %v1728_v0  ;;  %v1267_v2 = vld [vmem:[%s2777_s3 + $0x70] sm:$0xf]  ;;  %v1744_v3 = vld [vmem:[%s2777_s3 + $0x74] sm:$0xf0]  ;;  %v1743_v4 = vld [vmem:[%s2777_s3 + $0x74] sm:$0xf] }
   0x3   :  { %v1268_v5 = vor.u32 %v1744_v3, %v1267_v2  ;;  %v1269_v6 = vld [vmem:[%s2777_s3 + $0x78] sm:$0xf0]  ;;  %v1742_v8 = vld [vmem:[%s2777_s3 + $0x64] sm:$0xf0]  ;;  %v1741_v10 = vld [vmem:[%s2777_s3 + $0x64] sm:$0xf] }
   0x4   :  { %v1272_v9 = vor.u32 %v1743_v4, %v1269_v6  ;;  %v1261_v11 = vld [vmem:[%s2777_s3 + $0x68] sm:$0xf0]  ;;  %v1260_v13 = vor.u32 %v1742_v8, %v1259_v7  ;;  %v1251_v15 = vld [vmem:[%s2777_s3 + $0x50] sm:$0xf]  ;;  %v1740_v16 = vld [vmem:[%s2777_s3 + $0x54] sm:$0xf0] }
   0x5   :  { %v1726_v12 = vld [vmem:[%s2775_s1 + $0x28] sm:$0xff]  ;;  %213 = vmatpush.bf16.msra.mxu1 %v1268_v5  ;;  %v1264_v14 = vor.u32 %v1741_v10, %v1261_v11  ;;  %v1739_v17 = vld [vmem:[%s2777_s3 + $0x54] sm:$0xf]  ;;  %v1253_v18 = vld [vmem:[%s2777_s3 + $0x58] sm:$0xf0]  ;;  %v1252_v20 = vor.u32 %v1740_v16, %v1251_v15 }
   0x6   :  { %97 = vmatpush.bf16.msra.mxu0 %v1727_v1  ;;  %226 = vmatpush.bf16.msra.mxu2 %v1272_v9  ;;  %v1725_v19 = vld [vmem:[%s2775_s1 + $0x20] sm:$0xff]  ;;  %v1256_v22 = vor.u32 %v1739_v17, %v1253_v18  ;;  %v1738_v23 = vld [vmem:[%s2777_s3 + $0x44] sm:$0xf0] }
   0x7   :  { %v1243_v21 = vld [vmem:[%s2777_s3 + $0x40] sm:$0xf] }
   0x9   :  { %214 = vmatpush.bf16.msra.mxu1 %v1260_v13 }
   0xa   :  { %98 = vmatpush.bf16.msra.mxu0 %v1726_v12  ;;  %227 = vmatpush.bf16.msra.mxu2 %v1264_v14 }
   0xb   :  { %12 = vsyncpa [#allocation3], 0  ;;  %v1737_v24 = vld [vmem:[%s2777_s3 + $0x44] sm:$0xf]  ;;  %v1245_v25 = vld [vmem:[%s2777_s3 + $0x48] sm:$0xf0]  ;;  %v1244_v27 = vor.u32 %v1738_v23, %v1243_v21 }
   0xc   :  { %v1724_v26 = vld [vmem:[%s2775_s1 + $0x18] sm:$0xff]  ;;  %v1248_v28 = vor.u32 %v1737_v24, %v1245_v25  ;;  %v1235_v29 = vld [vmem:[%s2777_s3 + $0x30] sm:$0xf]  ;;  %v1735_v31 = vld [vmem:[%s2777_s3 + $0x34] sm:$0xf]  ;;  %s1168_s29 = sshll.u32 %s2781_s7, 4  ;;  %s1169_s29 = int_to_ptr.hbm [resolvable:$true] %s1168_s29 }
   0xd   :  { %215 = vmatpush.bf16.msra.mxu1 %v1252_v20  ;;  %v1736_v30 = vld [vmem:[%s2777_s3 + $0x34] sm:$0xf0]  ;;  %v1237_v32 = vld [vmem:[%s2777_s3 + $0x38] sm:$0xf0]  ;;  %v1723_v33 = vld [vmem:[%s2775_s1 + $0x10] sm:$0xff]  ;;  %vm1159_vm0 = vcmask 257024  }
   0xe   :  { %99 = vmatpush.bf16.msra.mxu0 %v1725_v19  ;;  %228 = vmatpush.bf16.msra.mxu2 %v1256_v22  ;;  %v1236_v34 = vor.u32 %v1736_v30, %v1235_v29  ;;  %v1240_v35 = vor.u32 %v1735_v31, %v1237_v32  ;;  %v1227_v36 = vld [vmem:[%s2777_s3 + $0x20] sm:$0xf]  ;;  %v1734_v37 = vld [vmem:[%s2777_s3 + $0x24] sm:$0xf0]  ;;  %v1733_v38 = vld [vmem:[%s2777_s3 + $0x24] sm:$0xf] }
   0xf   :  { %v1229_v39 = vld [vmem:[%s2777_s3 + $0x28] sm:$0xf0]  ;;  %v1228_v41 = vor.u32 %v1734_v37, %v1227_v36  ;;  %v1721_v43 = vld [vmem:[%s2775_s1] sm:$0xff]  ;;  %v1219_v45 = vld [vmem:[%s2777_s3 + $0x10] sm:$0xf] }
  0x10   :  { %v1722_v40 = vld [vmem:[%s2775_s1 + $0x8] sm:$0xff]  ;;  %v1232_v42 = vor.u32 %v1733_v38, %v1229_v39  ;;  %v27_v44 = vld [vmem:[%s2774_s0] sm:$0xf]  ;;  %v1732_v46 = vld [vmem:[%s2777_s3 + $0x14] sm:$0xf0] }
  0x11   :  { %216 = vmatpush.bf16.msra.mxu1 %v1244_v27  ;;  %v1731_v47 = vld [vmem:[%s2777_s3 + $0x14] sm:$0xf]  ;;  %v1220_v48 = vor.u32 %v1732_v46, %v1219_v45  ;;  %v1221_v49 = vld [vmem:[%s2777_s3 + $0x18] sm:$0xf0]  ;;  %v1211_v51 = vld [vmem:[%s2777_s3] sm:$0xf] }
  0x12   :  { %100 = vmatpush.bf16.msra.mxu0 %v1724_v26  ;;  %229 = vmatpush.bf16.msra.mxu2 %v1248_v28  ;;  %v1224_v50 = vor.u32 %v1731_v47, %v1221_v49  ;;  %v1730_v52 = vld [vmem:[%s2777_s3 + $0x4] sm:$0xf0]  ;;  %v1729_v53 = vld [vmem:[%s2777_s3 + $0x4] sm:$0xf]  ;;  %v1213_v55 = vld [vmem:[%s2777_s3 + $0x8] sm:$0xf0] }
  0x13   :  { %v1212_v54 = vor.u32 %v1730_v52, %v1211_v51  ;;  %v1216_v56 = vor.u32 %v1729_v53, %v1213_v55  ;;  %v1471_v57 = vld [vmem:[%s2779_s5 + $0x188] sm:$0xf]  ;;  %v1797_v58 = vld [vmem:[%s2779_s5 + $0x1a0] sm:$0xf0]  ;;  %v1794_v59 = vld [vmem:[%s2779_s5 + $0x18c] sm:$0xf] }
  0x14   :  { %v1472_v60 = vor.u32 %v1797_v58, %v1471_v57  ;;  %v1473_v61 = vld [vmem:[%s2779_s5 + $0x1a4] sm:$0xf0]  ;;  %v1443_v62 = vld [vmem:[%s2779_s5 + $0x150] sm:$0xf]  ;;  %v1790_v63 = vld [vmem:[%s2779_s5 + $0x168] sm:$0xf0] }
  0x15   :  { %217 = vmatpush.bf16.msra.mxu1 %v1236_v34  ;;  %v1476_v0 = vor.u32 %v1794_v59, %v1473_v61  ;;  %v1787_v1 = vld [vmem:[%s2779_s5 + $0x154] sm:$0xf]  ;;  %v1445_v2 = vld [vmem:[%s2779_s5 + $0x16c] sm:$0xf0]  ;;  %v1695_v3 = vld [vmem:[%s2779_s5 + $0x348] sm:$0xf]  ;;  %v1444_v4 = vor.u32 %v1790_v63, %v1443_v62 }
  0x16   :  { %101 = vmatpush.bf16.msra.mxu0 %v1723_v33  ;;  %230 = vmatpush.bf16.msra.mxu2 %v1240_v35  ;;  %v1853_v5 = vld [vmem:[%s2779_s5 + $0x360] sm:$0xf0]  ;;  %v1850_v6 = vld [vmem:[%s2779_s5 + $0x34c] sm:$0xf]  ;;  %v1697_v7 = vld [vmem:[%s2779_s5 + $0x364] sm:$0xf0]  ;;  %v1448_v8 = vor.u32 %v1787_v1, %v1445_v2 }
  0x17   :  { %963 = vmatpush.bf16.msra.mxu3 %v1472_v60  ;;  %v1696_v9 = vor.u32 %v1853_v5, %v1695_v3  ;;  %v1700_v10 = vor.u32 %v1850_v6, %v1697_v7  ;;  %v1415_v11 = vld [vmem:[%s2779_s5 + $0x118] sm:$0xf]  ;;  %v1783_v12 = vld [vmem:[%s2779_s5 + $0x130] sm:$0xf0]  ;;  %v1780_v13 = vld [vmem:[%s2779_s5 + $0x11c] sm:$0xf] }
  0x18   :  { %v1417_v14 = vld [vmem:[%s2779_s5 + $0x134] sm:$0xf0]  ;;  %v1667_v15 = vld [vmem:[%s2779_s5 + $0x310] sm:$0xf]  ;;  %v1846_v16 = vld [vmem:[%s2779_s5 + $0x328] sm:$0xf0]  ;;  %v1416_v20 = vor.u32 %v1783_v12, %v1415_v11 }
  0x19   :  { %218 = vmatpush.bf16.msra.mxu1 %v1228_v41  ;;  %v1668_v17 = vor.u32 %v1846_v16, %v1667_v15  ;;  %v1843_v18 = vld [vmem:[%s2779_s5 + $0x314] sm:$0xf]  ;;  %v1669_v19 = vld [vmem:[%s2779_s5 + $0x32c] sm:$0xf0]  ;;  %v1387_v22 = vld [vmem:[%s2779_s5 + $0xe0] sm:$0xf]  ;;  %v1420_v24 = vor.u32 %v1780_v13, %v1417_v14 }
  0x1a   :  { %102 = vmatpush.bf16.msra.mxu0 %v1722_v40  ;;  %231 = vmatpush.bf16.msra.mxu2 %v1232_v42  ;;  %v1672_v21 = vor.u32 %v1843_v18, %v1669_v19  ;;  %v1776_v23 = vld [vmem:[%s2779_s5 + $0xf8] sm:$0xf0]  ;;  %v1639_v25 = vld [vmem:[%s2779_s5 + $0x2d8] sm:$0xf]  ;;  %v1839_v26 = vld [vmem:[%s2779_s5 + $0x2f0] sm:$0xf0] }
  0x1b   :  { %964 = vmatpush.bf16.msra.mxu3 %v1444_v4  ;;  %v1836_v27 = vld [vmem:[%s2779_s5 + $0x2dc] sm:$0xf]  ;;  %v1773_v28 = vld [vmem:[%s2779_s5 + $0xe4] sm:$0xf]  ;;  %v1389_v29 = vld [vmem:[%s2779_s5 + $0xfc] sm:$0xf0]  ;;  %v1640_v31 = vor.u32 %v1839_v26, %v1639_v25  ;;  %v1388_v34 = vor.u32 %v1776_v23, %v1387_v22 }
  0x1c   :  { %v1641_v30 = vld [vmem:[%s2779_s5 + $0x2f4] sm:$0xf0]  ;;  %v1611_v33 = vld [vmem:[%s2779_s5 + $0x2a0] sm:$0xf]  ;;  %v1832_v35 = vld [vmem:[%s2779_s5 + $0x2b8] sm:$0xf0]  ;;  %v1392_v38 = vor.u32 %v1773_v28, %v1389_v29 }
  0x1d   :  { %219 = vmatpush.bf16.msra.mxu1 %v1220_v48  ;;  %v1644_v32 = vor.u32 %v1836_v27, %v1641_v30  ;;  %v1829_v36 = vld [vmem:[%s2779_s5 + $0x2a4] sm:$0xf]  ;;  %v1613_v37 = vld [vmem:[%s2779_s5 + $0x2bc] sm:$0xf0]  ;;  %v1359_v39 = vld [vmem:[%s2779_s5 + $0xa8] sm:$0xf] }
  0x1e   :  { %103 = vmatpush.bf16.msra.mxu0 %v1721_v43  ;;  %232 = vmatpush.bf16.msra.mxu2 %v1224_v50  ;;  %v1769_v40 = vld [vmem:[%s2779_s5 + $0xc0] sm:$0xf0]  ;;  %v1766_v41 = vld [vmem:[%s2779_s5 + $0xac] sm:$0xf]  ;;  %v1361_v42 = vld [vmem:[%s2779_s5 + $0xc4] sm:$0xf0]  ;;  %v1612_v43 = vor.u32 %v1832_v35, %v1611_v33 }
  0x1f   :  { %965 = vmatpush.bf16.msra.mxu3 %v1416_v20  ;;  %v1583_v45 = vld [vmem:[%s2779_s5 + $0x268] sm:$0xf]  ;;  %v1360_v46 = vor.u32 %v1769_v40, %v1359_v39  ;;  %v1825_v47 = vld [vmem:[%s2779_s5 + $0x280] sm:$0xf0]  ;;  %v1822_v48 = vld [vmem:[%s2779_s5 + $0x26c] sm:$0xf]  ;;  %v1364_v50 = vor.u32 %v1766_v41, %v1361_v42 }
  0x20   :  { %v1585_v49 = vld [vmem:[%s2779_s5 + $0x284] sm:$0xf0]  ;;  %v1331_v51 = vld [vmem:[%s2779_s5 + $0x70] sm:$0xf]  ;;  %v1762_v52 = vld [vmem:[%s2779_s5 + $0x88] sm:$0xf0]  ;;  %v1584_v55 = vor.u32 %v1825_v47, %v1583_v45 }
  0x21   :  { %104 = vmatmul.bf16.vlgmr.msra.gmra.mxu0 %v27_v44  ;;  %220 = vmatpush.bf16.msra.mxu1 %v1212_v54  ;;  %v1616_v44 = vor.u32 %v1829_v36, %v1613_v37  ;;  %v1759_v53 = vld [vmem:[%s2779_s5 + $0x74] sm:$0xf]  ;;  %v1333_v54 = vld [vmem:[%s2779_s5 + $0x8c] sm:$0xf0]  ;;  %v1332_v58 = vor.u32 %v1762_v52, %v1331_v51  ;;  %v1818_v59 = vld [vmem:[%s2779_s5 + $0x248] sm:$0xf0] }
  0x22   :  { %233 = vmatpush.bf16.msra.mxu2 %v1216_v56  ;;  %976 = vmatpush.bf16.msrb.mxu0 %v1696_v9  ;;  %v1588_v56 = vor.u32 %v1822_v48, %v1585_v49  ;;  %v1555_v57 = vld [vmem:[%s2779_s5 + $0x230] sm:$0xf]  ;;  %v1815_v60 = vld [vmem:[%s2779_s5 + $0x234] sm:$0xf]  ;;  %v1336_v62 = vor.u32 %v1759_v53, %v1333_v54  ;;  %v1303_v63 = vld [vmem:[%s2779_s5 + $0x38] sm:$0xf] }
  0x23   :  { %966 = vmatpush.bf16.msra.mxu3 %v1388_v34  ;;  %v1557_v61 = vld [vmem:[%s2779_s5 + $0x24c] sm:$0xf0]  ;;  %v1858_v1 = vld [vmem:[%s2776_s2] ss:$0 sm:$0xff]  ;;  %v1752_v2 = vld [vmem:[%s2779_s5 + $0x3c] sm:$0xf]  ;;  %v1556_v4 = vor.u32 %v1818_v59, %v1555_v57 }
  0x24   :  { %v1305_v3 = vld [vmem:[%s2779_s5 + $0x54] sm:$0xf0]  ;;  %v1560_v5 = vor.u32 %v1815_v60, %v1557_v61  ;;  %v1748_v9 = vld [vmem:[%s2779_s5 + $0x18] sm:$0xf0]  ;;  %v1745_v15 = vld [vmem:[%s2779_s5 + $0x4] sm:$0xf] }
  0x25   :  { %989 = vmatpush.bf16.msrb.mxu1 %v1476_v0  ;;  %v1755_v0 = vld [vmem:[%s2779_s5 + $0x50] sm:$0xf0]  ;;  %v1527_v6 = vld [vmem:[%s2779_s5 + $0x1f8] sm:$0xf]  ;;  %v1808_v11 = vld [vmem:[%s2779_s5 + $0x1fc] sm:$0xf]  ;;  %v1308_v14 = vor.u32 %v1752_v2, %v1305_v3 }
  0x26   :  { %1002 = vmatpush.bf16.msrb.mxu2 %v1700_v10  ;;  %977 = vmatpush.bf16.msrb.mxu0 %v1668_v17  ;;  %v1304_v7 = vor.u32 %v1755_v0, %v1303_v63  ;;  %v1811_v10 = vld [vmem:[%s2779_s5 + $0x210] sm:$0xf0]  ;;  %v1529_v12 = vld [vmem:[%s2779_s5 + $0x214] sm:$0xf0]  ;;  %v1277_v16 = vld [vmem:[%s2779_s5 + $0x1c] sm:$0xf0] }
  0x27   :  { %967 = vmatpush.bf16.msra.mxu3 %v1360_v46  ;;  %v1479_v17 = vld [vmem:[%s2779_s5 + $0x190] sm:$0xf]  ;;  %v1798_v19 = vld [vmem:[%s2779_s5 + $0x1a8] sm:$0xf0]  ;;  %v1795_v20 = vld [vmem:[%s2779_s5 + $0x194] sm:$0xf]  ;;  %v1528_v22 = vor.u32 %v1811_v10, %v1527_v6  ;;  %v1532_v23 = vor.u32 %v1808_v11, %v1529_v12 }
  0x28   :  { %v1804_v25 = vld [vmem:[%s2779_s5 + $0x1d8] sm:$0xf0]  ;;  %v1801_v26 = vld [vmem:[%s2779_s5 + $0x1c4] sm:$0xf]  ;;  %v1501_v28 = vld [vmem:[%s2779_s5 + $0x1dc] sm:$0xf0]  ;;  %v1480_v36 = vor.u32 %v1798_v19, %v1479_v17 }
  0x29   :  { %990 = vmatpush.bf16.msrb.mxu1 %v1448_v8  ;;  %v1275_v8 = vld [vmem:[%s2779_s5] sm:$0xf]  ;;  %v1703_v29 = vld [vmem:[%s2779_s5 + $0x350] sm:$0xf]  ;;  %v1851_v33 = vld [vmem:[%s2779_s5 + $0x354] sm:$0xf] }
  0x2a   :  { %1003 = vmatpush.bf16.msrb.mxu2 %v1672_v21  ;;  %978 = vmatpush.bf16.msrb.mxu0 %v1640_v31  ;;  %v1481_v21 = vld [vmem:[%s2779_s5 + $0x1ac] sm:$0xf0]  ;;  %v1276_v30 = vor.u32 %v1748_v9, %v1275_v8  ;;  %v1280_v31 = vor.u32 %v1745_v15, %v1277_v16  ;;  %v1791_v39 = vld [vmem:[%s2779_s5 + $0x170] sm:$0xf0]  ;;  %v1788_v41 = vld [vmem:[%s2779_s5 + $0x15c] sm:$0xf] }
  0x2b   :  { %968 = vmatpush.bf16.msra.mxu3 %v1332_v58  ;;  %v1705_v34 = vld [vmem:[%s2779_s5 + $0x36c] sm:$0xf0]  ;;  %v1484_v37 = vor.u32 %v1795_v20, %v1481_v21  ;;  %v1453_v42 = vld [vmem:[%s2779_s5 + $0x174] sm:$0xf0]  ;;  %v1847_v48 = vld [vmem:[%s2779_s5 + $0x330] sm:$0xf0] }
  0x2c   :  { %v1708_v45 = vor.u32 %v1851_v33, %v1705_v34  ;;  %v1675_v46 = vld [vmem:[%s2779_s5 + $0x318] sm:$0xf]  ;;  %v1844_v49 = vld [vmem:[%s2779_s5 + $0x31c] sm:$0xf]  ;;  %v1456_v52 = vor.u32 %v1788_v41, %v1453_v42  ;;  %v1423_v53 = vld [vmem:[%s2779_s5 + $0x120] sm:$0xf] }
  0x2d   :  { %991 = vmatpush.bf16.msrb.mxu1 %v1420_v24  ;;  %v1499_v24 = vld [vmem:[%s2779_s5 + $0x1c0] sm:$0xf]  ;;  %v1784_v54 = vld [vmem:[%s2779_s5 + $0x138] sm:$0xf0]  ;;  %v1676_v57 = vor.u32 %v1847_v48, %v1675_v46  ;;  %v1837_v61 = vld [vmem:[%s2779_s5 + $0x2e4] sm:$0xf] }
  0x2e   :  { %1004 = vmatpush.bf16.msrb.mxu2 %v1644_v32  ;;  %979 = vmatpush.bf16.msrb.mxu0 %v1612_v43  ;;  %v1854_v32 = vld [vmem:[%s2779_s5 + $0x368] sm:$0xf0]  ;;  %v1500_v40 = vor.u32 %v1804_v25, %v1499_v24  ;;  %v1504_v43 = vor.u32 %v1801_v26, %v1501_v28  ;;  %v1647_v59 = vld [vmem:[%s2779_s5 + $0x2e0] sm:$0xf]  ;;  %v1840_v60 = vld [vmem:[%s2779_s5 + $0x2f8] sm:$0xf0]  ;;  %v1424_v63 = vor.u32 %v1784_v54, %v1423_v53 }
  0x2f   :  { %969 = vmatpush.bf16.msra.mxu3 %v1304_v7  ;;  %v1777_v2 = vld [vmem:[%s2779_s5 + $0x100] sm:$0xf0]  ;;  %v1774_v3 = vld [vmem:[%s2779_s5 + $0xec] sm:$0xf]  ;;  %v1619_v7 = vld [vmem:[%s2779_s5 + $0x2a8] sm:$0xf] }
  0x30   :  { %v1833_v8 = vld [vmem:[%s2779_s5 + $0x2c0] sm:$0xf0]  ;;  %v1830_v9 = vld [vmem:[%s2779_s5 + $0x2ac] sm:$0xf]  ;;  %v1621_v10 = vld [vmem:[%s2779_s5 + $0x2c4] sm:$0xf0] }
  0x31   :  { %992 = vmatpush.bf16.msrb.mxu1 %v1392_v38  ;;  %v1451_v38 = vld [vmem:[%s2779_s5 + $0x158] sm:$0xf]  ;;  %v1767_v15 = vld [vmem:[%s2779_s5 + $0xb4] sm:$0xf]  ;;  %v1369_v16 = vld [vmem:[%s2779_s5 + $0xcc] sm:$0xf0]  ;;  %v1620_v17 = vor.u32 %v1833_v8, %v1619_v7 }
  0x32   :  { %1005 = vmatpush.bf16.msrb.mxu2 %v1616_v44  ;;  %980 = vmatpush.bf16.msrb.mxu0 %v1584_v55  ;;  %v1704_v44 = vor.u32 %v1854_v32, %v1703_v29  ;;  %v1452_v51 = vor.u32 %v1791_v39, %v1451_v38  ;;  %v1781_v55 = vld [vmem:[%s2779_s5 + $0x124] sm:$0xf]  ;;  %v1372_v20 = vor.u32 %v1767_v15, %v1369_v16  ;;  %v1339_v21 = vld [vmem:[%s2779_s5 + $0x78] sm:$0xf]  ;;  %v1826_v28 = vld [vmem:[%s2779_s5 + $0x288] sm:$0xf0] }
  0x33   :  { %970 = vmatpush.bf16.msra.mxu3 %v1276_v30  ;;  %v1341_v24 = vld [vmem:[%s2779_s5 + $0x94] sm:$0xf0]  ;;  %v1823_v30 = vld [vmem:[%s2779_s5 + $0x274] sm:$0xf]  ;;  %v1311_v33 = vld [vmem:[%s2779_s5 + $0x40] sm:$0xf] }
  0x34   :  { %v1756_v34 = vld [vmem:[%s2779_s5 + $0x58] sm:$0xf0]  ;;  %v1563_v39 = vld [vmem:[%s2779_s5 + $0x238] sm:$0xf]  ;;  %v1749_v46 = vld [vmem:[%s2779_s5 + $0x20] sm:$0xf0] }
  0x35   :  { %993 = vmatpush.bf16.msrb.mxu1 %v1364_v50  ;;  %v1677_v50 = vld [vmem:[%s2779_s5 + $0x334] sm:$0xf0]  ;;  %v1816_v42 = vld [vmem:[%s2779_s5 + $0x23c] sm:$0xf]  ;;  %v1746_v48 = vld [vmem:[%s2779_s5 + $0xc] sm:$0xf] }
  0x36   :  { %1006 = vmatpush.bf16.msrb.mxu2 %v1588_v56  ;;  %981 = vmatpush.bf16.msrb.mxu0 %v1556_v4  ;;  %v1425_v56 = vld [vmem:[%s2779_s5 + $0x13c] sm:$0xf0]  ;;  %v1680_v58 = vor.u32 %v1844_v49, %v1677_v50  ;;  %v1397_v4 = vld [vmem:[%s2779_s5 + $0x104] sm:$0xf0]  ;;  %v1809_v54 = vld [vmem:[%s2779_s5 + $0x204] sm:$0xf] }
  0x37   :  { %1015 = vmatpush.bf16.msrb.mxu3 %v1480_v36  ;;  %v1428_v0 = vor.u32 %v1781_v55, %v1425_v56  ;;  %v1400_v12 = vor.u32 %v1774_v3, %v1397_v4  ;;  %v1753_v36 = vld [vmem:[%s2779_s5 + $0x44] sm:$0xf]  ;;  %v1285_v49 = vld [vmem:[%s2779_s5 + $0x24] sm:$0xf0]  ;;  %v1537_v55 = vld [vmem:[%s2779_s5 + $0x21c] sm:$0xf0] }
  0x38   :  { %v1288_v50 = vor.u32 %v1746_v48, %v1285_v49  ;;  %v1540_v56 = vor.u32 %v1809_v54, %v1537_v55  ;;  %v1799_v4 = vld [vmem:[%s2779_s5 + $0x1b0] sm:$0xf0]  ;;  %v1461_v15 = vld [vmem:[%s2779_s5 + $0x17c] sm:$0xf0]  ;;  %v1838_v48 = vld [vmem:[%s2779_s5 + $0x2ec] sm:$0xf] }
  0x39   :  { %994 = vmatpush.bf16.msrb.mxu1 %v1336_v62  ;;  %v1649_v62 = vld [vmem:[%s2779_s5 + $0x2fc] sm:$0xf0]  ;;  %v1657_v49 = vld [vmem:[%s2779_s5 + $0x304] sm:$0xf0]  ;;  %v1768_v54 = vld [vmem:[%s2779_s5 + $0xbc] sm:$0xf] }
  0x3a   :  { %1007 = vmatpush.bf16.msrb.mxu2 %v1560_v5  ;;  %982 = vmatpush.bf16.msrb.mxu0 %v1528_v22  ;;  %v1648_v5 = vor.u32 %v1840_v60, %v1647_v59  ;;  %v1652_v6 = vor.u32 %v1837_v61, %v1649_v62  ;;  %v1763_v22 = vld [vmem:[%s2779_s5 + $0x90] sm:$0xf0]  ;;  %v1802_v60 = vld [vmem:[%s2779_s5 + $0x1cc] sm:$0xf]  ;;  %v1509_v61 = vld [vmem:[%s2779_s5 + $0x1e4] sm:$0xf0] }
  0x3b   :  { %1016 = vmatpush.bf16.msrb.mxu3 %v1452_v51  ;;  %v1340_v25 = vor.u32 %v1763_v22, %v1339_v21  ;;  %v1535_v51 = vld [vmem:[%s2779_s5 + $0x200] sm:$0xf]  ;;  %v1512_v62 = vor.u32 %v1802_v60, %v1509_v61  ;;  %v1713_v21 = vld [vmem:[%s2779_s5 + $0x374] sm:$0xf0]  ;;  %v1831_v60 = vld [vmem:[%s2779_s5 + $0x2b4] sm:$0xf] }
  0x3c   :  { %v1377_v55 = vld [vmem:[%s2779_s5 + $0xd4] sm:$0xf0]  ;;  %v1629_v61 = vld [vmem:[%s2779_s5 + $0x2cc] sm:$0xf0] }
  0x3d   :  { %995 = vmatpush.bf16.msrb.mxu1 %v1308_v14  ;;  %v1770_v14 = vld [vmem:[%s2779_s5 + $0xc8] sm:$0xf0] }
  0x3e   :  { %1008 = vmatpush.bf16.msrb.mxu2 %v1532_v23  ;;  %983 = vmatpush.bf16.msrb.mxu0 %v1500_v40  ;;  %v1760_v23 = vld [vmem:[%s2779_s5 + $0x7c] sm:$0xf]  ;;  %v1819_v40 = vld [vmem:[%s2779_s5 + $0x250] sm:$0xf0] }
  0x3f   :  { %1017 = vmatpush.bf16.msrb.mxu3 %v1424_v63  ;;  %v1344_v26 = vor.u32 %v1760_v23, %v1341_v24  ;;  %v1564_v41 = vor.u32 %v1819_v40, %v1563_v39  ;;  %v127_v63 = vld [vmem:[%s2778_s4] sm:$0x3]  ;;  %v1403_v39 = vld [vmem:[%s2779_s5 + $0xf0] sm:$0xf]  ;;  %v1778_v40 = vld [vmem:[%s2779_s5 + $0x108] sm:$0xf0] }
  0x40   :  { %v130_v8 = vperm.slane %v127_v63, 1 }
  0x41   :  { %996 = vmatpush.bf16.msrb.mxu1 %v1280_v31  ;;  %v1593_v31 = vld [vmem:[%s2779_s5 + $0x28c] sm:$0xf0] }
  0x42   :  { %1009 = vmatpush.bf16.msrb.mxu2 %v1504_v43  ;;  %1028 = vmatpush.bf16.msra.mxu0 %v1704_v44  ;;  %v1596_v32 = vor.u32 %v1823_v30, %v1593_v31  ;;  %v1565_v43 = vld [vmem:[%s2779_s5 + $0x254] sm:$0xf0] }
  0x43   :  { %v1568_v44 = vor.u32 %v1816_v42, %v1565_v43  ;;  %v1405_v42 = vld [vmem:[%s2779_s5 + $0x10c] sm:$0xf0] }
  0x46   :  { %1029 = vmatpush.bf16.msra.mxu0 %v1676_v57  ;;  %v1507_v57 = vld [vmem:[%s2779_s5 + $0x1c8] sm:$0xf] }
  0x4a   :  { %1030 = vmatpush.bf16.msra.mxu0 %v1648_v5  ;;  %v1796_v5 = vld [vmem:[%s2779_s5 + $0x19c] sm:$0xf] }
  0x4e   :  { %1031 = vmatpush.bf16.msra.mxu0 %v1620_v17  ;;  %v1711_v17 = vld [vmem:[%s2779_s5 + $0x358] sm:$0xf] }
  0x9e   :  { %v105_v13 = vpop.f32.mrf.mxu0 }
  0x9f   :  { %v106_v18 = vadd.f32 %v1858_v1, %v105_v13  ;;  %v1395_v1 = vld [vmem:[%s2779_s5 + $0xe8] sm:$0xf]  ;;  %v1367_v13 = vld [vmem:[%s2779_s5 + $0xb0] sm:$0xf] }
  0xa0   :  { %v1396_v11 = vor.u32 %v1777_v2, %v1395_v1  ;;  %v1368_v19 = vor.u32 %v1770_v14, %v1367_v13  ;;  %v1487_v2 = vld [vmem:[%s2779_s5 + $0x198] sm:$0xf]  ;;  %v1792_v13 = vld [vmem:[%s2779_s5 + $0x178] sm:$0xf0]  ;;  %v1789_v14 = vld [vmem:[%s2779_s5 + $0x164] sm:$0xf] }
  0xa1   :  { %v109_v27 = vmax.f32 %v106_v18, 0.0  ;;  %v1624_v18 = vor.u32 %v1830_v9, %v1621_v10  ;;  %v1488_v9 = vor.u32 %v1799_v4, %v1487_v2  ;;  %v1464_v24 = vor.u32 %v1789_v14, %v1461_v15  ;;  %v1761_v2 = vld [vmem:[%s2779_s5 + $0x84] sm:$0xf]  ;;  %v1754_v15 = vld [vmem:[%s2779_s5 + $0x4c] sm:$0xf] }
  0xa2   :  { %1018 = vmatpush.bf16.msrb.mxu3 %v1396_v11  ;;  %v1459_v11 = vld [vmem:[%s2779_s5 + $0x160] sm:$0xf]  ;;  %v1757_v14 = vld [vmem:[%s2779_s5 + $0x60] sm:$0xf0] }
  0xa3   :  { %v110_v35 = vpack.c.bf16 %v109_v27, %v109_v27  ;;  %v1591_v27 = vld [vmem:[%s2779_s5 + $0x270] sm:$0xf]  ;;  %v1460_v23 = vor.u32 %v1792_v13, %v1459_v11  ;;  %v1319_v13 = vld [vmem:[%s2779_s5 + $0x48] sm:$0xf] }
  0xa4   :  { %v1592_v29 = vor.u32 %v1826_v28, %v1591_v27  ;;  %v1782_v28 = vld [vmem:[%s2779_s5 + $0x12c] sm:$0xf] }
  0xa5   :  { %221 = vmatmul.bf16.vlgmr.msra.gmra.mxu1 %v110_v35  ;;  %234 = vmatmul.bf16.vlgmr.msra.gmra.mxu2 %v110_v35  ;;  %v1312_v35 = vor.u32 %v1756_v34, %v1311_v33  ;;  %v1848_v34 = vld [vmem:[%s2779_s5 + $0x338] sm:$0xf0] }
  0xa6   :  { %v107_v47 = vpop.f32.mrf.mxu0  ;;  %1041 = vmatpush.bf16.msra.mxu1 %v1484_v37  ;;  %1054 = vmatpush.bf16.msra.mxu2 %v1708_v45  ;;  %v1313_v37 = vld [vmem:[%s2779_s5 + $0x5c] sm:$0xf0]  ;;  %v1283_v45 = vld [vmem:[%s2779_s5 + $0x8] sm:$0xf] }
  0xa7   :  { %1019 = vmatpush.bf16.msrb.mxu3 %v1368_v19  ;;  %1032 = vmatpush.bf16.msra.mxu0 %v1592_v29  ;;  %v1316_v38 = vor.u32 %v1753_v36, %v1313_v37  ;;  %v1284_v47 = vor.u32 %v1749_v46, %v1283_v45  ;;  %v1855_v19 = vld [vmem:[%s2779_s5 + $0x370] sm:$0xf0]  ;;  %v1433_v29 = vld [vmem:[%s2779_s5 + $0x144] sm:$0xf0]  ;;  %v1685_v36 = vld [vmem:[%s2779_s5 + $0x33c] sm:$0xf0] }
  0xa8   :  { %v1712_v30 = vor.u32 %v1855_v19, %v1711_v17  ;;  %v1655_v46 = vld [vmem:[%s2779_s5 + $0x2e8] sm:$0xf]  ;;  %v1571_v19 = vld [vmem:[%s2779_s5 + $0x240] sm:$0xf] }
  0xaa   :  { %1042 = vmatpush.bf16.msra.mxu1 %v1456_v52  ;;  %1055 = vmatpush.bf16.msra.mxu2 %v1680_v58  ;;  %v1812_v52 = vld [vmem:[%s2779_s5 + $0x218] sm:$0xf0]  ;;  %v1805_v58 = vld [vmem:[%s2779_s5 + $0x1e0] sm:$0xf0] }
  0xab   :  { %1020 = vmatpush.bf16.msrb.mxu3 %v1340_v25  ;;  %1033 = vmatpush.bf16.msra.mxu0 %v1564_v41  ;;  %v1536_v53 = vor.u32 %v1812_v52, %v1535_v51  ;;  %v1508_v59 = vor.u32 %v1805_v58, %v1507_v57  ;;  %v1431_v25 = vld [vmem:[%s2779_s5 + $0x128] sm:$0xf]  ;;  %v1775_v41 = vld [vmem:[%s2779_s5 + $0xf4] sm:$0xf]  ;;  %v1375_v52 = vld [vmem:[%s2779_s5 + $0xb8] sm:$0xf]  ;;  %v1660_v57 = vor.u32 %v1838_v48, %v1657_v49 }
  0xac   :  { %v1408_v51 = vor.u32 %v1775_v41, %v1405_v42  ;;  %v1627_v58 = vld [vmem:[%s2779_s5 + $0x2b0] sm:$0xf]  ;;  %v1719_v49 = vld [vmem:[%s2779_s5 + $0x360] sm:$0xf] }
  0xad   :  { %v1517_v48 = vld [vmem:[%s2779_s5 + $0x1ec] sm:$0xf0] }
  0xae   :  { %1043 = vmatpush.bf16.msra.mxu1 %v1428_v0  ;;  %1056 = vmatpush.bf16.msra.mxu2 %v1652_v6  ;;  %v129_v0 = vperm.slane %v127_v63, 0  ;;  %v1489_v6 = vld [vmem:[%s2779_s5 + $0x1b4] sm:$0xf0]  ;;  %v1380_v63 = vor.u32 %v1768_v54, %v1377_v55  ;;  %v1439_v54 = vld [vmem:[%s2779_s5 + $0x130] sm:$0xf] }
  0xaf   :  { %1021 = vmatpush.bf16.msrb.mxu3 %v1312_v35  ;;  %1034 = vmatpush.bf16.msra.mxu0 %v1536_v53  ;;  %v1492_v10 = vor.u32 %v1796_v5, %v1489_v6  ;;  %v1845_v35 = vld [vmem:[%s2779_s5 + $0x324] sm:$0xf]  ;;  %v1771_v53 = vld [vmem:[%s2779_s5 + $0xd0] sm:$0xf0]  ;;  %v1632_v5 = vor.u32 %v1831_v60, %v1629_v61  ;;  %v1599_v6 = vld [vmem:[%s2779_s5 + $0x278] sm:$0xf] }
  0xb0   :  { %v1688_v45 = vor.u32 %v1845_v35, %v1685_v36  ;;  %v1813_v35 = vld [vmem:[%s2779_s5 + $0x220] sm:$0xf0]  ;;  %v1810_v36 = vld [vmem:[%s2779_s5 + $0x20c] sm:$0xf]  ;;  %v1411_v60 = vld [vmem:[%s2779_s5 + $0xf8] sm:$0xf] }
  0xb1   :  { %v1786_v55 = vld [vmem:[%s2779_s5 + $0x148] sm:$0xf0]  ;;  %v1779_v61 = vld [vmem:[%s2779_s5 + $0x110] sm:$0xf0] }
  0xb2   :  { %1044 = vmatpush.bf16.msra.mxu1 %v1400_v12  ;;  %1057 = vmatpush.bf16.msra.mxu2 %v1624_v18 }
  0xb3   :  { %1022 = vmatpush.bf16.msrb.mxu3 %v1284_v47  ;;  %1035 = vmatpush.bf16.msra.mxu0 %v1508_v59  ;;  %v1841_v47 = vld [vmem:[%s2779_s5 + $0x300] sm:$0xf0]  ;;  %v1834_v59 = vld [vmem:[%s2779_s5 + $0x2c8] sm:$0xf0] }
  0xb4   :  { %v1628_v4 = vor.u32 %v1834_v59, %v1627_v58  ;;  %v1849_v58 = vld [vmem:[%s2779_s5 + $0x340] sm:$0xf0]  ;;  %v1440_v59 = vor.u32 %v1786_v55, %v1439_v54 }
  0xb6   :  { %1045 = vmatpush.bf16.msra.mxu1 %v1372_v20  ;;  %1058 = vmatpush.bf16.msra.mxu2 %v1596_v32  ;;  %v1852_v20 = vld [vmem:[%s2779_s5 + $0x35c] sm:$0xf]  ;;  %v1683_v32 = vld [vmem:[%s2779_s5 + $0x320] sm:$0xf] }
  0xb7   :  { %v1716_v31 = vor.u32 %v1852_v20, %v1713_v21  ;;  %v1820_v20 = vld [vmem:[%s2779_s5 + $0x258] sm:$0xf0]  ;;  %v1817_v21 = vld [vmem:[%s2779_s5 + $0x244] sm:$0xf] }
  0xba   :  { %1046 = vmatpush.bf16.msra.mxu1 %v1344_v26  ;;  %1059 = vmatpush.bf16.msra.mxu2 %v1568_v44  ;;  %v1785_v26 = vld [vmem:[%s2779_s5 + $0x140] sm:$0xf0]  ;;  %v1684_v44 = vor.u32 %v1848_v34, %v1683_v32  ;;  %v1800_v32 = vld [vmem:[%s2779_s5 + $0x1b8] sm:$0xf0]  ;;  %v1543_v34 = vld [vmem:[%s2779_s5 + $0x208] sm:$0xf] }
  0xbb   :  { %v1432_v37 = vor.u32 %v1785_v26, %v1431_v25  ;;  %v1291_v25 = vld [vmem:[%s2779_s5 + $0x10] sm:$0xf]  ;;  %v1750_v26 = vld [vmem:[%s2779_s5 + $0x28] sm:$0xf0]  ;;  %v1544_v41 = vor.u32 %v1813_v35, %v1543_v34 }
  0xbe   :  { %1047 = vmatpush.bf16.msra.mxu1 %v1316_v38  ;;  %1060 = vmatpush.bf16.msra.mxu2 %v1540_v56  ;;  %v1436_v38 = vor.u32 %v1782_v28, %v1433_v29  ;;  %v1656_v56 = vor.u32 %v1841_v47, %v1655_v46  ;;  %v1293_v28 = vld [vmem:[%s2779_s5 + $0x2c] sm:$0xf0]  ;;  %v1572_v29 = vor.u32 %v1820_v20, %v1571_v19  ;;  %v1806_v46 = vld [vmem:[%s2779_s5 + $0x1e8] sm:$0xf0]  ;;  %v1803_v47 = vld [vmem:[%s2779_s5 + $0x1d4] sm:$0xf] }
  0xbf   :  { %v1821_v19 = vld [vmem:[%s2779_s5 + $0x260] sm:$0xf0] }
  0xc2   :  { %1048 = vmatpush.bf16.msra.mxu1 %v1288_v50  ;;  %1061 = vmatpush.bf16.msra.mxu2 %v1512_v62  ;;  %v1404_v50 = vor.u32 %v1778_v40, %v1403_v39  ;;  %v1376_v62 = vor.u32 %v1771_v53, %v1375_v52  ;;  %v1520_v53 = vor.u32 %v1803_v47, %v1517_v48 }
 0x122   :  { %v222_v1 = vpop.f32.mrf.mxu1 }
 0x123   :  { %v223_v3 = vadd.f32 %v222_v1, %v129_v0  ;;  %v1347_v0 = vld [vmem:[%s2779_s5 + $0x80] sm:$0xf]  ;;  %v1764_v1 = vld [vmem:[%s2779_s5 + $0x98] sm:$0xf0] }
 0x125   :  { %v239_v7 = vmax.f32 %v223_v3, 0.0  ;;  %v1349_v3 = vld [vmem:[%s2779_s5 + $0x9c] sm:$0xf0] }
 0x126   :  { %v1352_v11 = vor.u32 %v1761_v2, %v1349_v3  ;;  %v1383_v2 = vld [vmem:[%s2779_s5 + $0xc0] sm:$0xf]  ;;  %v1772_v3 = vld [vmem:[%s2779_s5 + $0xd8] sm:$0xf0] }
 0x127   :  { %v2468_v12 = vpack.c.bf16 %v239_v7, %v239_v7  ;;  %v1827_v7 = vld [vmem:[%s2779_s5 + $0x290] sm:$0xf0] }
 0x128   :  { %v235_v16 = vpop.f32.mrf.mxu2  ;;  %v1600_v17 = vor.u32 %v1827_v7, %v1599_v6  ;;  %v1835_v6 = vld [vmem:[%s2779_s5 + $0x2d0] sm:$0xf0]  ;;  %v1384_v7 = vor.u32 %v1772_v3, %v1383_v2 }
 0x129   :  { %v236_v18 = vadd.f32 %v235_v16, %v130_v8  ;;  %971 = vmatmul.bf16.vlgmr.msra.gmra.mxu3 %v2468_v12  ;;  %997 = vmatmul.bf16.vlgmr.msrb.gmra.mxu1 %v2468_v12  ;;  %v1824_v8 = vld [vmem:[%s2779_s5 + $0x27c] sm:$0xf]  ;;  %v1321_v16 = vld [vmem:[%s2779_s5 + $0x64] sm:$0xf0] }
 0x12a   :  { %1067 = vmatpush.bf16.msra.mxu3 %v1488_v9  ;;  %v224_v22 = vpop.f32.mrf.mxu1  ;;  %1093 = vmatpush.bf16.msrb.mxu1 %v1492_v10  ;;  %v1601_v9 = vld [vmem:[%s2779_s5 + $0x294] sm:$0xf0]  ;;  %v1348_v10 = vor.u32 %v1764_v1, %v1347_v0  ;;  %v1842_v0 = vld [vmem:[%s2779_s5 + $0x308] sm:$0xf0]  ;;  %v1412_v1 = vor.u32 %v1779_v61, %v1411_v60 }
 0x12b   :  { %v240_v27 = vmax.f32 %v236_v18, 0.0  ;;  %v1604_v18 = vor.u32 %v1824_v8, %v1601_v9  ;;  %v1573_v22 = vld [vmem:[%s2779_s5 + $0x25c] sm:$0xf0]  ;;  %v1355_v8 = vld [vmem:[%s2779_s5 + $0x88] sm:$0xf] }
 0x12c   :  { %v1765_v9 = vld [vmem:[%s2779_s5 + $0xa0] sm:$0xf0] }
 0x12d   :  { %v2508_v33 = vpack.c.bf16 %v240_v27, %v240_v27  ;;  %v1747_v27 = vld [vmem:[%s2779_s5 + $0x14] sm:$0xf] }
 0x12e   :  { %1068 = vmatpush.bf16.msra.mxu3 %v1460_v23  ;;  %1094 = vmatpush.bf16.msrb.mxu1 %v1464_v24  ;;  %v1320_v23 = vor.u32 %v1757_v14, %v1319_v13  ;;  %v1324_v24 = vor.u32 %v1754_v15, %v1321_v16  ;;  %v1296_v39 = vor.u32 %v1747_v27, %v1293_v28  ;;  %v1828_v13 = vld [vmem:[%s2779_s5 + $0x298] sm:$0xf0]  ;;  %v1327_v15 = vld [vmem:[%s2779_s5 + $0x50] sm:$0xf]  ;;  %v1758_v16 = vld [vmem:[%s2779_s5 + $0x68] sm:$0xf0] }
 0x12f   :  { %984 = vmatmul.bf16.vlgmr.msrb.gmra.mxu0 %v2508_v33  ;;  %1010 = vmatmul.bf16.vlgmr.msrb.gmra.mxu2 %v2508_v33  ;;  %v1356_v14 = vor.u32 %v1765_v9, %v1355_v8  ;;  %v1328_v20 = vor.u32 %v1758_v16, %v1327_v15  ;;  %v1523_v28 = vld [vmem:[%s2779_s5 + $0x1d8] sm:$0xf] }
 0x130   :  { %1080 = vmatpush.bf16.msrb.mxu0 %v1712_v30  ;;  %v237_v43 = vpop.f32.mrf.mxu2  ;;  %1106 = vmatpush.bf16.msrb.mxu2 %v1716_v31  ;;  %v1576_v30 = vor.u32 %v1817_v21, %v1573_v22  ;;  %v1495_v31 = vld [vmem:[%s2779_s5 + $0x1a0] sm:$0xf]  ;;  %v1299_v21 = vld [vmem:[%s2779_s5 + $0x18] sm:$0xf]  ;;  %v1751_v22 = vld [vmem:[%s2779_s5 + $0x30] sm:$0xf0] }
 0x131   :  { %v1496_v40 = vor.u32 %v1800_v32, %v1495_v31  ;;  %v1467_v43 = vld [vmem:[%s2779_s5 + $0x168] sm:$0xf]  ;;  %v2762_v32 = vld [vmem:[%s2780_s6] sm:$0x7f] }
 0x132   :  { %1069 = vmatpush.bf16.msra.mxu3 %v1432_v37  ;;  %1095 = vmatpush.bf16.msrb.mxu1 %v1436_v38  ;;  %v1545_v37 = vld [vmem:[%s2779_s5 + $0x224] sm:$0xf0]  ;;  %v1292_v38 = vor.u32 %v1750_v26, %v1291_v25  ;;  %v1814_v25 = vld [vmem:[%s2779_s5 + $0x228] sm:$0xf0]  ;;  %v1300_v26 = vor.u32 %v1751_v22, %v1299_v21  ;;  %v373_v34 = vperm.slane %v2762_v32, 0 }
 0x133   :  { %v1548_v42 = vor.u32 %v1810_v36, %v1545_v37  ;;  %v374_v37 = vperm.slane %v2762_v32, 1 }
 0x134   :  { %1081 = vmatpush.bf16.msrb.mxu0 %v1684_v44  ;;  %1107 = vmatpush.bf16.msrb.mxu2 %v1688_v45  ;;  %v1793_v44 = vld [vmem:[%s2779_s5 + $0x180] sm:$0xf0]  ;;  %v1515_v45 = vld [vmem:[%s2779_s5 + $0x1d0] sm:$0xf] }
 0x135   :  { %v1516_v52 = vor.u32 %v1806_v46, %v1515_v45  ;;  %v375_v45 = vperm.slane %v2762_v32, 2 }
 0x136   :  { %1070 = vmatpush.bf16.msra.mxu3 %v1404_v50  ;;  %1096 = vmatpush.bf16.msrb.mxu1 %v1408_v51  ;;  %v1856_v50 = vld [vmem:[%s2779_s5 + $0x378] sm:$0xf0]  ;;  %v1468_v51 = vor.u32 %v1793_v44, %v1467_v43 }
 0x138   :  { %1082 = vmatpush.bf16.msrb.mxu0 %v1656_v56  ;;  %1108 = vmatpush.bf16.msrb.mxu2 %v1660_v57  ;;  %v1720_v56 = vor.u32 %v1856_v50, %v1719_v49  ;;  %v1691_v57 = vld [vmem:[%s2779_s5 + $0x328] sm:$0xf] }
 0x139   :  { %1023 = vmatmul.bf16.vlgmr.msrb.gmra.mxu3 %v2468_v12  ;;  %1049 = vmatmul.bf16.vlgmr.msra.gmra.mxu1 %v2468_v12 }
 0x13a   :  { %1071 = vmatpush.bf16.msra.mxu3 %v1376_v62  ;;  %1097 = vmatpush.bf16.msrb.mxu1 %v1380_v63  ;;  %v1692_v62 = vor.u32 %v1849_v58, %v1691_v57  ;;  %v1663_v63 = vld [vmem:[%s2779_s5 + $0x2f0] sm:$0xf] }
 0x13c   :  { %1083 = vmatpush.bf16.msrb.mxu0 %v1628_v4  ;;  %1109 = vmatpush.bf16.msrb.mxu2 %v1632_v5  ;;  %v1664_v4 = vor.u32 %v1842_v0, %v1663_v63  ;;  %v1635_v5 = vld [vmem:[%s2779_s5 + $0x2b8] sm:$0xf] }
 0x13e   :  { %1072 = vmatpush.bf16.msra.mxu3 %v1348_v10  ;;  %1098 = vmatpush.bf16.msrb.mxu1 %v1352_v11  ;;  %v1636_v10 = vor.u32 %v1835_v6, %v1635_v5  ;;  %v1607_v11 = vld [vmem:[%s2779_s5 + $0x280] sm:$0xf]  ;;  %v378_v6 = vperm.slane %v2762_v32, 5 }
 0x13f   :  { %1036 = vmatmul.bf16.vlgmr.msra.gmra.mxu0 %v2508_v33  ;;  %1062 = vmatmul.bf16.vlgmr.msra.gmra.mxu2 %v2508_v33 }
 0x140   :  { %1084 = vmatpush.bf16.msrb.mxu0 %v1600_v17  ;;  %1110 = vmatpush.bf16.msrb.mxu2 %v1604_v18  ;;  %v1608_v17 = vor.u32 %v1828_v13, %v1607_v11  ;;  %v1579_v18 = vld [vmem:[%s2779_s5 + $0x248] sm:$0xf] }
 0x142   :  { %1073 = vmatpush.bf16.msra.mxu3 %v1320_v23  ;;  %1099 = vmatpush.bf16.msrb.mxu1 %v1324_v24  ;;  %v1580_v23 = vor.u32 %v1821_v19, %v1579_v18  ;;  %v1551_v24 = vld [vmem:[%s2779_s5 + $0x210] sm:$0xf]  ;;  %v379_v19 = vperm.slane %v2762_v32, 6 }
 0x143   :  { %v1552_v27 = vor.u32 %v1814_v25, %v1551_v24 }
 0x144   :  { %1085 = vmatpush.bf16.msrb.mxu0 %v1572_v29  ;;  %1111 = vmatpush.bf16.msrb.mxu2 %v1576_v30  ;;  %v1807_v29 = vld [vmem:[%s2779_s5 + $0x1f0] sm:$0xf0]  ;;  %s1899_s5 = smov [#allocation2]  }
 0x145   :  { %v1524_v30 = vor.u32 %v1807_v29, %v1523_v28  ;;  %s1166_s6 = sshll.u32 %s1899_s5, 4  ;;  %s1167_s6 = int_to_ptr.vmem [resolvable:$true] %s1166_s6 }
 0x146   :  { %1074 = vmatpush.bf16.msra.mxu3 %v1292_v38  ;;  %1100 = vmatpush.bf16.msrb.mxu1 %v1296_v39 }
 0x148   :  { %1086 = vmatpush.bf16.msrb.mxu0 %v1544_v41  ;;  %1112 = vmatpush.bf16.msrb.mxu2 %v1548_v42 }
 0x149   :  { %1075 = vmatmul.bf16.vlgmr.msra.gmra.mxu3 %v2468_v12  ;;  %1101 = vmatmul.bf16.vlgmr.msrb.gmra.mxu1 %v2468_v12 }
 0x14a   :  { %1119 = vmatpush.bf16.msrb.mxu3 %v1496_v40 }
 0x14c   :  { %1087 = vmatpush.bf16.msrb.mxu0 %v1516_v52  ;;  %1113 = vmatpush.bf16.msrb.mxu2 %v1520_v53  ;;  %v376_v52 = vperm.slane %v2762_v32, 3 }
 0x14e   :  { %1120 = vmatpush.bf16.msrb.mxu3 %v1468_v51 }
 0x14f   :  { %1088 = vmatmul.bf16.vlgmr.msrb.gmra.mxu0 %v2508_v33  ;;  %1114 = vmatmul.bf16.vlgmr.msrb.gmra.mxu2 %v2508_v33 }
 0x150   :  { %1132 = vmatpush.bf16.msra.mxu0 %v1720_v56 }
 0x152   :  { %1121 = vmatpush.bf16.msrb.mxu3 %v1440_v59 }
 0x154   :  { %1133 = vmatpush.bf16.msra.mxu0 %v1692_v62  ;;  %v377_v62 = vperm.slane %v2762_v32, 4 }
 0x156   :  { %1122 = vmatpush.bf16.msrb.mxu3 %v1412_v1 }
 0x158   :  { %1134 = vmatpush.bf16.msra.mxu0 %v1664_v4 }
 0x15a   :  { %1123 = vmatpush.bf16.msrb.mxu3 %v1384_v7 }
 0x15c   :  { %1135 = vmatpush.bf16.msra.mxu0 %v1636_v10 }
 0x15e   :  { %1124 = vmatpush.bf16.msrb.mxu3 %v1356_v14 }
 0x160   :  { %1136 = vmatpush.bf16.msra.mxu0 %v1608_v17 }
 0x162   :  { %1125 = vmatpush.bf16.msrb.mxu3 %v1328_v20 }
 0x164   :  { %1137 = vmatpush.bf16.msra.mxu0 %v1580_v23 }
 0x166   :  { %1126 = vmatpush.bf16.msrb.mxu3 %v1300_v26 }
 0x168   :  { %1138 = vmatpush.bf16.msra.mxu0 %v1552_v27 }
 0x169   :  { %1127 = vmatmul.bf16.vlgmr.msrb.gmra.mxu3 %v2468_v12 }
 0x16c   :  { %1139 = vmatpush.bf16.msra.mxu0 %v1524_v30 }
 0x16f   :  { %1140 = vmatmul.bf16.vlgmr.msra.gmra.mxu0 %v2508_v33 }
 0x1a6   :  { %v998_v31 = vpop.f32.mrf.mxu1 }
 0x1a7   :  { %v999_v41 = vadd.f32 %v998_v31, %v374_v37 }
 0x1ac   :  { %v972_v35 = vpop.f32.mrf.mxu3  ;;  %v985_v36 = vpop.f32.mrf.mxu0 }
 0x1ad   :  { %v973_v38 = vadd.f32 %v972_v35, %v373_v34 }
 0x1ae   :  { %v1000_v39 = vpop.f32.mrf.mxu1 }
 0x1af   :  { %v986_v40 = vadd.f32 %v985_v36, %v973_v38 }
 0x1b1   :  { %1859 = vtanh.f32 %v986_v40 }
 0x1b2   :  { %v1011_v12 = vpop.f32.mrf.mxu2 }
 0x1b3   :  { %v1012_v42 = vadd.f32 %v1011_v12, %v999_v41 }
 0x1b4   :  { %v974_v33 = vpop.f32.mrf.mxu3  ;;  %v987_v43 = vpop.f32.mrf.mxu0 }
 0x1b5   :  { %1861 = vtanh.f32 %v1012_v42 }
 0x1b6   :  { %v1050_v44 = vpop.f32.mrf.mxu1 }
 0x1b7   :  { %v1860_v46 = vpop.eup %1859  ;;  %v1051_v56 = vadd.f32 %v1050_v44, %v376_v52 }
 0x1ba   :  { %v1013_v47 = vpop.f32.mrf.mxu2 }
 0x1bb   :  { %v1862_v48 = vpop.eup %1861 }
 0x1bc   :  { %v1152_v49 = vpack.c.bf16 %v1862_v48, %v1860_v46  ;;  %v1024_v50 = vpop.f32.mrf.mxu3  ;;  %v1037_v51 = vpop.f32.mrf.mxu0 }
 0x1bd   :  { %v1025_v53 = vadd.f32 %v1024_v50, %v375_v45 }
 0x1be   :  { %1156 = vst [vmem:[#allocation2] sm:$0xff] %v1152_v49  ;;  %v1052_v54 = vpop.f32.mrf.mxu1 }
 0x1bf   :  { %v1038_v55 = vadd.f32 %v1037_v51, %v1025_v53 }
 0x1c1   :  { %1863 = vtanh.f32 %v1038_v55 }
 0x1c2   :  { %v1063_v57 = vpop.f32.mrf.mxu2 }
 0x1c3   :  { %v1064_v58 = vadd.f32 %v1063_v57, %v1051_v56 }
 0x1c4   :  { %v1026_v59 = vpop.f32.mrf.mxu3  ;;  %v1039_v60 = vpop.f32.mrf.mxu0 }
 0x1c5   :  { %1865 = vtanh.f32 %v1064_v58 }
 0x1c6   :  { %v1102_v61 = vpop.f32.mrf.mxu1 }
 0x1c7   :  { %v1864_v63 = vpop.eup %1863  ;;  %v1103_v9 = vadd.f32 %v1102_v61, %v378_v6 }
 0x1ca   :  { %v1065_v0 = vpop.f32.mrf.mxu2 }
 0x1cb   :  { %v1866_v1 = vpop.eup %1865 }
 0x1cc   :  { %v1153_v2 = vpack.c.bf16 %v1866_v1, %v1864_v63  ;;  %v1076_v3 = vpop.f32.mrf.mxu3  ;;  %v1089_v4 = vpop.f32.mrf.mxu0 }
 0x1cd   :  { %v1077_v5 = vadd.f32 %v1076_v3, %v377_v62 }
 0x1ce   :  { %1157 = vst [vmem:[#allocation2 + $0x8] sm:$0xff] %v1153_v2  ;;  %v1104_v7 = vpop.f32.mrf.mxu1 }
 0x1cf   :  { %v1090_v8 = vadd.f32 %v1089_v4, %v1077_v5 }
 0x1d1   :  { %1867 = vtanh.f32 %v1090_v8 }
 0x1d2   :  { %v1115_v10 = vpop.f32.mrf.mxu2 }
 0x1d3   :  { %v1116_v11 = vadd.f32 %v1115_v10, %v1103_v9 }
 0x1d4   :  { %v1078_v13 = vpop.f32.mrf.mxu3  ;;  %v1091_v14 = vpop.f32.mrf.mxu0 }
 0x1d5   :  { %1869 = vtanh.f32 %v1116_v11 }
 0x1d7   :  { %v1868_v15 = vpop.eup %1867 }
 0x1da   :  { %v1117_v16 = vpop.f32.mrf.mxu2 }
 0x1db   :  { %v1870_v17 = vpop.eup %1869 }
 0x1dc   :  { %v1154_v18 = vpack.c.bf16 %v1870_v17, %v1868_v15 }
 0x1de   :  { %1158 = vst [vmem:[#allocation2 + $0x10] sm:$0xff] %v1154_v18 }
 0x1ec   :  { %v1128_v20 = vpop.f32.mrf.mxu3  ;;  %v1141_v21 = vpop.f32.mrf.mxu0 }
 0x1ed   :  { %v1129_v22 = vadd.f32 %v1128_v20, %v379_v19 }
 0x1ef   :  { %v1142_v23 = vadd.f32 %v1141_v21, %v1129_v22 }
 0x1f1   :  { %1871 = vtanh.f32 %v1142_v23 }
 0x1f4   :  { %v1130_v24 = vpop.f32.mrf.mxu3  ;;  %v1143_v25 = vpop.f32.mrf.mxu0 }
 0x1f7   :  { %v1872_v26 = vpop.eup %1871 }
 0x1f8   :  { %v1155_v27 = vpack.c.bf16 %v1872_v26, %v1872_v26 }
 0x1fa   :  { %1160 = vst.msk [vmem:[#allocation2 + $0x18] sm:$0xf] %vm1159_vm0, %v1155_v27 }
 0x1fb   :  { %1171 = dma.vmem_to_hbm [thread:$0]  %s1167_s6, 448, %s1169_s29, [#allocation3]  }
 0x1fc   :  { %1897 = dma.done.wait [#allocation3], 448  }
 0x1fd   :  { %1898 = vsyncadd [#allocation3], 4294966848 }
 0x1fe   :  { %1176 = vsyncpa [#allocation3], 1 }

</bundles_post_ra>
